<compile_context>
chip_gen: v5e
topology: v5e:2x2
jax: 0.10.0
libtpu: 0.0.40
codegen_flags: <defaults>
</compile_context>

<pallas_src>
import functools

import jax
import jax.numpy as jnp
from jax.experimental import pallas as pl
from jax.experimental.pallas import tpu as pltpu


def _mlp_kernel(x_ref, w1_ref, b1_ref, w2_ref, b2_ref, w3_ref, b3_ref, o_ref):
    cdt = x_ref.dtype  # compute dtype of the MXU inputs (f32 or bf16)
    x = x_ref[...]                                                     # [9,  BT]
    h1 = jnp.dot(w1_ref[...], x, preferred_element_type=jnp.float32)   # [64, BT] f32
    h1 = jnp.maximum(h1 + b1_ref[...], 0.0).astype(cdt)                # relu
    h2 = jnp.dot(w2_ref[...], h1, preferred_element_type=jnp.float32)  # [64, BT] f32
    h2 = jnp.maximum(h2 + b2_ref[...], 0.0).astype(cdt)                # relu
    o = jnp.dot(w3_ref[...], h2, preferred_element_type=jnp.float32)   # [9,  BT] f32
    o_ref[...] = (o + b3_ref[...]).astype(o_ref.dtype)


@functools.partial(jax.jit, static_argnames=("block_b", "compute_dtype"))
def nn1_forward(x, params, *, block_b=512, compute_dtype=jnp.float32):
    """x: [B, 9] float32. params: torch-layout weights w[out, in], biases b[out, 1]."""
    B, f_in = x.shape
    assert f_in == 9
    f_out = 9

    bt = int(block_b)
    bp = bt * pl.cdiv(B, bt)  # padded batch (multiple of the tile)

    # Feature-major (batch-on-lanes) layout, zero-padded to a multiple of BT.
    xt = jnp.zeros((f_in, bp), x.dtype).at[:, :B].set(x.T).astype(compute_dtype)

    w1 = params["w1"].astype(compute_dtype)          # [64, 9]
    w2 = params["w2"].astype(compute_dtype)          # [64, 64]
    w3 = params["w3"].astype(compute_dtype)          # [9, 64]
    b1, b2, b3 = params["b1"], params["b2"], params["b3"]  # [out, 1] f32

    # Full-extent, VMEM-resident blocks for the (tiny) weights / biases.
    resident = lambda a: pl.BlockSpec(a.shape, lambda i: (0, 0))

    out_t = pl.pallas_call(
        _mlp_kernel,
        out_shape=jax.ShapeDtypeStruct((f_out, bp), jnp.float32),
        grid=(bp // bt,),
        in_specs=[
            pl.BlockSpec((f_in, bt), lambda i: (0, i)),   # streamed x tile
            resident(w1), resident(b1),
            resident(w2), resident(b2),
            resident(w3), resident(b3),
        ],
        out_specs=pl.BlockSpec((f_out, bt), lambda i: (0, i)),
        compiler_params=pltpu.CompilerParams(
            dimension_semantics=("parallel",),            # engage both TCs on v7x
        ),
    )(xt, w1, b1, w2, b2, w3, b3)

    return out_t[:, :B].T                                 # back to [B, 9]


def init_params(key):
    """Deterministic init matching NN1's Linear layers.

    Weights in torch-native [out, in] layout (kernel computes W @ x);
    biases as [out, 1] columns so they broadcast over the lane (batch) axis.
    """
    ks = jax.random.split(key, 6)

    def linear(kw, kb, fan_in, fan_out):
        # torch default init: U(-1/sqrt(fan_in), 1/sqrt(fan_in))
        bound = 1.0 / jnp.sqrt(jnp.float32(fan_in))
        w = jax.random.uniform(kw, (fan_out, fan_in), jnp.float32, -bound, bound)
        b = jax.random.uniform(kb, (fan_out, 1), jnp.float32, -bound, bound)
        return w, b

    w1, b1 = linear(ks[0], ks[1], 9, 64)
    w2, b2 = linear(ks[2], ks[3], 64, 64)
    w3, b3 = linear(ks[4], ks[5], 64, 9)
    return {"w1": w1, "b1": b1, "w2": w2, "b2": b2, "w3": w3, "b3": b3}


def nn1_reference(x, p):
    h1 = jnp.maximum(x @ p["w1"].T + p["b1"].T, 0.0)
    h2 = jnp.maximum(h1 @ p["w2"].T + p["b2"].T, 0.0)
    return h2 @ p["w3"].T + p["b3"].T


if __name__ == "__main__":
    key = jax.random.PRNGKey(0)
    k_param, k_x = jax.random.split(key)

    params = init_params(k_param)
    x = jax.random.normal(k_x, (8, 9), dtype=jnp.float32)   # batch=8, features=9

    # f32 path
    out = jax.block_until_ready(nn1_forward(x, params))
    ref = nn1_reference(x, params)
    assert out.shape == (8, 9)
    assert jnp.allclose(out, ref, atol=1e-4, rtol=1e-4), "f32 mismatch vs reference"

    # bf16 input/weight path (f32 accumulate / bias / relu inside the kernel)
    out_bf16 = jax.block_until_ready(
        nn1_forward(x, params, compute_dtype=jnp.bfloat16))
    assert jnp.allclose(out_bf16, ref, atol=5e-2, rtol=5e-2), "bf16 mismatch"

    # Larger batch: exercises multiple pipelined grid steps (3 tiles of 512).
    xb = jax.random.normal(jax.random.PRNGKey(1), (1536, 9), dtype=jnp.float32)
    outb = jax.block_until_ready(nn1_forward(xb, params, block_b=512))
    assert jnp.allclose(outb, nn1_reference(xb, params), atol=1e-4, rtol=1e-4), \
        "large-batch mismatch vs reference"

    print("KERNEL_OK")
</pallas_src>

<mosaic_0001>
module attributes {stable_mosaic.version = 11 : i64} {
  func.func @_mlp_kernel(%arg0: i32, %arg1: memref<9x512xf32, #tpu.memory_space<vmem>>, %arg2: memref<64x9xf32, #tpu.memory_space<vmem>>, %arg3: memref<64x1xf32, #tpu.memory_space<vmem>>, %arg4: memref<64x64xf32, #tpu.memory_space<vmem>>, %arg5: memref<64x1xf32, #tpu.memory_space<vmem>>, %arg6: memref<9x64xf32, #tpu.memory_space<vmem>>, %arg7: memref<9x1xf32, #tpu.memory_space<vmem>>, %arg8: memref<9x512xf32, #tpu.memory_space<vmem>>) attributes {dimension_semantics = [#tpu.dimension_semantics<parallel>], iteration_bounds = array<i64: 1>, scalar_prefetch = 0 : i64, scratch_operands = 0 : i64, tpu.core_type = #tpu.core_type<tc>, window_params = [{transform_indices = @transform_0, window_bounds = array<i64: 9, 512>}, {pipeline_mode = #tpu.pipeline_mode<synchronous>, transform_indices = @transform_1, window_bounds = array<i64: 64, 9>}, {pipeline_mode = #tpu.pipeline_mode<synchronous>, transform_indices = @transform_2, window_bounds = array<i64: 64, 1>}, {pipeline_mode = #tpu.pipeline_mode<synchronous>, transform_indices = @transform_3, window_bounds = array<i64: 64, 64>}, {pipeline_mode = #tpu.pipeline_mode<synchronous>, transform_indices = @transform_4, window_bounds = array<i64: 64, 1>}, {pipeline_mode = #tpu.pipeline_mode<synchronous>, transform_indices = @transform_5, window_bounds = array<i64: 9, 64>}, {pipeline_mode = #tpu.pipeline_mode<synchronous>, transform_indices = @transform_6, window_bounds = array<i64: 9, 1>}, {transform_indices = @transform_7, window_bounds = array<i64: 9, 512>}]} {
    %c0 = arith.constant 0 : index
    %c0_0 = arith.constant 0 : index
    %0 = vector.load %arg1[%c0, %c0_0] : memref<9x512xf32, #tpu.memory_space<vmem>>, vector<9x512xf32>
    %c0_1 = arith.constant 0 : index
    %c0_2 = arith.constant 0 : index
    %1 = vector.load %arg2[%c0_1, %c0_2] : memref<64x9xf32, #tpu.memory_space<vmem>>, vector<64x9xf32>
    %cst = arith.constant dense<0.000000e+00> : vector<64x512xf32>
    %2 = tpu.matmul %1, %0, %cst {dimension_numbers = #tpu.dot_dimension_numbers<[1], [0], [0], [1], [0, 0, 1, 1], [], []>} : vector<64x9xf32>, vector<9x512xf32>, vector<64x512xf32> -> vector<64x512xf32>
    %c0_3 = arith.constant 0 : index
    %c0_4 = arith.constant 0 : index
    %3 = vector.load %arg3[%c0_3, %c0_4] : memref<64x1xf32, #tpu.memory_space<vmem>>, vector<64x1xf32>
    %4 = vector.broadcast %3 : vector<64x1xf32> to vector<64x512xf32>
    %5 = arith.addf %2, %4 : vector<64x512xf32>
    %cst_5 = arith.constant 0.000000e+00 : f32
    %6 = vector.broadcast %cst_5 : f32 to vector<64x512xf32>
    %7 = arith.maximumf %5, %6 : vector<64x512xf32>
    %c0_6 = arith.constant 0 : index
    %c0_7 = arith.constant 0 : index
    %8 = vector.load %arg4[%c0_6, %c0_7] : memref<64x64xf32, #tpu.memory_space<vmem>>, vector<64x64xf32>
    %cst_8 = arith.constant dense<0.000000e+00> : vector<64x512xf32>
    %9 = tpu.matmul %8, %7, %cst_8 {dimension_numbers = #tpu.dot_dimension_numbers<[1], [0], [0], [1], [0, 0, 1, 1], [], []>} : vector<64x64xf32>, vector<64x512xf32>, vector<64x512xf32> -> vector<64x512xf32>
    %c0_9 = arith.constant 0 : index
    %c0_10 = arith.constant 0 : index
    %10 = vector.load %arg5[%c0_9, %c0_10] : memref<64x1xf32, #tpu.memory_space<vmem>>, vector<64x1xf32>
    %11 = vector.broadcast %10 : vector<64x1xf32> to vector<64x512xf32>
    %12 = arith.addf %9, %11 : vector<64x512xf32>
    %cst_11 = arith.constant 0.000000e+00 : f32
    %13 = vector.broadcast %cst_11 : f32 to vector<64x512xf32>
    %14 = arith.maximumf %12, %13 : vector<64x512xf32>
    %c0_12 = arith.constant 0 : index
    %c0_13 = arith.constant 0 : index
    %15 = vector.load %arg6[%c0_12, %c0_13] : memref<9x64xf32, #tpu.memory_space<vmem>>, vector<9x64xf32>
    %cst_14 = arith.constant dense<0.000000e+00> : vector<9x512xf32>
    %16 = tpu.matmul %15, %14, %cst_14 {dimension_numbers = #tpu.dot_dimension_numbers<[1], [0], [0], [1], [0, 0, 1, 1], [], []>} : vector<9x64xf32>, vector<64x512xf32>, vector<9x512xf32> -> vector<9x512xf32>
    %c0_15 = arith.constant 0 : index
    %c0_16 = arith.constant 0 : index
    %17 = vector.load %arg7[%c0_15, %c0_16] : memref<9x1xf32, #tpu.memory_space<vmem>>, vector<9x1xf32>
    %18 = vector.broadcast %17 : vector<9x1xf32> to vector<9x512xf32>
    %19 = arith.addf %16, %18 : vector<9x512xf32>
    %c0_17 = arith.constant 0 : index
    %c0_18 = arith.constant 0 : index
    %20 = vector.load %arg8[%c0_17, %c0_18] : memref<9x512xf32, #tpu.memory_space<vmem>>, vector<9x512xf32>
    tpu.vector_store %arg8[%c0_17, %c0_18], %19 {strides = array<i32>} : memref<9x512xf32, #tpu.memory_space<vmem>>, vector<9x512xf32>,
    return
  }
  func.func @transform_0(%arg0: i32) -> (i32, i32) {
    %c0_i32 = arith.constant 0 : i32
    %c0_i32_0 = arith.constant 0 : i32
    return %c0_i32, %arg0 : i32, i32
  }
  func.func @transform_1(%arg0: i32) -> (i32, i32) {
    %c0_i32 = arith.constant 0 : i32
    %c0_i32_0 = arith.constant 0 : i32
    %c0_i32_1 = arith.constant 0 : i32
    return %c0_i32, %c0_i32_0 : i32, i32
  }
  func.func @transform_2(%arg0: i32) -> (i32, i32) {
    %c0_i32 = arith.constant 0 : i32
    %c0_i32_0 = arith.constant 0 : i32
    %c0_i32_1 = arith.constant 0 : i32
    return %c0_i32, %c0_i32_0 : i32, i32
  }
  func.func @transform_3(%arg0: i32) -> (i32, i32) {
    %c0_i32 = arith.constant 0 : i32
    %c0_i32_0 = arith.constant 0 : i32
    %c0_i32_1 = arith.constant 0 : i32
    return %c0_i32, %c0_i32_0 : i32, i32
  }
  func.func @transform_4(%arg0: i32) -> (i32, i32) {
    %c0_i32 = arith.constant 0 : i32
    %c0_i32_0 = arith.constant 0 : i32
    %c0_i32_1 = arith.constant 0 : i32
    return %c0_i32, %c0_i32_0 : i32, i32
  }
  func.func @transform_5(%arg0: i32) -> (i32, i32) {
    %c0_i32 = arith.constant 0 : i32
    %c0_i32_0 = arith.constant 0 : i32
    %c0_i32_1 = arith.constant 0 : i32
    return %c0_i32, %c0_i32_0 : i32, i32
  }
  func.func @transform_6(%arg0: i32) -> (i32, i32) {
    %c0_i32 = arith.constant 0 : i32
    %c0_i32_0 = arith.constant 0 : i32
    %c0_i32_1 = arith.constant 0 : i32
    return %c0_i32, %c0_i32_0 : i32, i32
  }
  func.func @transform_7(%arg0: i32) -> (i32, i32) {
    %c0_i32 = arith.constant 0 : i32
    %c0_i32_0 = arith.constant 0 : i32
    return %c0_i32, %arg0 : i32, i32
  }
}

</mosaic_0001>

<bundles_post_ra>
// kernel: nn1_forward.1
= control target key start
LH: loop header
LB: loop body
LE: loop exit
PB: predicated region body
PF: predicated region fallthrough
CT: control target
= control target key end

     0   :  { %vm115_vm0 = vcmask 1040384   ;;  %v805_v3 = vmov 0   ;;  %vm90_vm1 = vcmask 72704   ;;  %vm380_vm2 = vcmask 523264   ;;  %s1170_s0 = inlined_call_operand.vmem [shape: f32[9,512], index: 0, kind: input, shape index: {}]   ;;  %s1171_s1 = inlined_call_operand.vmem [shape: f32[64,9], index: 1, kind: input, shape index: {}]   ;;  %s1172_s2 = inlined_call_operand.vmem [shape: f32[64,1], index: 2, kind: input, shape index: {}]   ;;  %s1173_s4 = inlined_call_operand.vmem [shape: f32[64,1], index: 4, kind: input, shape index: {}]   ;;  %s1174_s6 = inlined_call_operand.vmem [shape: f32[9,1], index: 6, kind: input, shape index: {}]   ;;  %s1175_s3 = inlined_call_operand.vmem [shape: f32[64,64], index: 3, kind: input, shape index: {}]   ;;  %s1176_s5 = inlined_call_operand.vmem [shape: f32[9,64], index: 5, kind: input, shape index: {}]   ;;  %s1177_s7 = inlined_call_operand.vmem [shape: f32[9,512], index: 7, kind: output, shape index: {}]  }
   0x1   :  { %v30_v0 = vld [vmem:[%s1170_s0 + $0x20] sm:$0x1]  ;;  %v31_v1 = vld [vmem:[%s1170_s0 + $0x28] sm:$0x1]  ;;  %v32_v2 = vld [vmem:[%s1170_s0 + $0x30] sm:$0x1]  ;;  %803 = vset.pattern.permute.xlu1 %v805_v3  ;;  %802 = vset.pattern.permute.xlu0 %v805_v3 }
   0x2   :  { %725 = vmatpush.msk.msra.mxu0 %vm115_vm0, %v30_v0  ;;  %734 = vmatpush.msk.msra.mxu1 %vm115_vm0, %v31_v1  ;;  %v33_v4 = vld [vmem:[%s1170_s0 + $0x38] sm:$0x1]  ;;  %v26_v5 = vld [vmem:[%s1170_s0] sm:$0xff]  ;;  %v27_v6 = vld [vmem:[%s1170_s0 + $0x8] sm:$0xff] }
   0x3   :  { %743 = vmatpush.msk.msra.mxu2 %vm115_vm0, %v32_v2  ;;  %752 = vmatpush.msk.msra.mxu3 %vm115_vm0, %v33_v4  ;;  %v28_v7 = vld [vmem:[%s1170_s0 + $0x10] sm:$0xff]  ;;  %v29_v8 = vld [vmem:[%s1170_s0 + $0x18] sm:$0xff]  ;;  %v34_v9 = vld [vmem:[%s1171_s1] sm:$0xff] }
   0x4   :  { %143 = vmatpush.msra.mxu0 %v26_v5  ;;  %184 = vmatpush.msra.mxu1 %v27_v6  ;;  %v47_v10 = vld [vmem:[%s1172_s2 + $0x28] sm:$0xff]  ;;  %v49_v11 = vld [vmem:[%s1172_s2 + $0x38] sm:$0xff]  ;;  %v46_v13 = vld [vmem:[%s1172_s2 + $0x20] sm:$0xff] }
   0x5   :  { %225 = vmatpush.msra.mxu2 %v28_v7  ;;  %266 = vmatpush.msra.mxu3 %v29_v8  ;;  %v35_v12 = vld [vmem:[%s1171_s1 + $0x8] sm:$0xff]  ;;  %v48_v14 = vld [vmem:[%s1172_s2 + $0x30] sm:$0xff]  ;;  %v42_v16 = vld [vmem:[%s1172_s2] sm:$0xff] }
   0x6   :  { %726 = vmatmul.msk.f32.vlgmr.msra.gmra.mxu0 %vm90_vm1, %v34_v9  ;;  %735 = vmatmul.msk.f32.vlgmr.msra.gmra.mxu1 %vm90_vm1, %v34_v9  ;;  %v36_v15 = vld [vmem:[%s1171_s1 + $0x10] sm:$0xff]  ;;  %v43_v17 = vld [vmem:[%s1172_s2 + $0x8] sm:$0xff]  ;;  %v45_v18 = vld [vmem:[%s1172_s2 + $0x18] sm:$0xff] }
   0x7   :  { %744 = vmatmul.msk.f32.vlgmr.msra.gmra.mxu2 %vm90_vm1, %v34_v9  ;;  %753 = vmatmul.msk.f32.vlgmr.msra.gmra.mxu3 %vm90_vm1, %v34_v9  ;;  %v37_v19 = vld [vmem:[%s1171_s1 + $0x18] sm:$0xff]  ;;  %v338_v20 = vld [vmem:[%s1173_s4 + $0x30] sm:$0xff]  ;;  %v337_v21 = vld [vmem:[%s1173_s4 + $0x28] sm:$0xff] }
   0x8   :  { %77 = vperm.xlu1 %803, %v47_v10   ;;  %87 = vperm.xlu0 %802, %v49_v11   ;;  %v44_v22 = vld [vmem:[%s1172_s2 + $0x10] sm:$0xff]  ;;  %v38_v23 = vld [vmem:[%s1171_s1 + $0x20] sm:$0xff]  ;;  %v335_v24 = vld [vmem:[%s1173_s4 + $0x18] sm:$0xff] }
   0x9   :  { %804 = vset.pattern.permute.xlu2 %v805_v3  ;;  %v334_v25 = vld [vmem:[%s1173_s4 + $0x10] sm:$0xff]  ;;  %v339_v26 = vld [vmem:[%s1173_s4 + $0x38] sm:$0xff]  ;;  %v39_v27 = vld [vmem:[%s1171_s1 + $0x28] sm:$0xff] }
   0xa   :  { %67 = vperm.xlu2 %804, %v45_v18   ;;  %v332_v28 = vld [vmem:[%s1173_s4] sm:$0xff]  ;;  %v40_v31 = vld [vmem:[%s1171_s1 + $0x30] sm:$0xff]  ;;  %v333_v32 = vld [vmem:[%s1173_s4 + $0x8] sm:$0xff] }
   0xb   :  { %v603_v29 = vld [vmem:[%s1174_s6] sm:$0xff]  ;;  %v41_v33 = vld [vmem:[%s1171_s1 + $0x38] sm:$0xff]  ;;  %v604_v34 = vld [vmem:[%s1174_s6 + $0x8] sm:$0x1] }
   0xc   :  { %v336_v30 = vld [vmem:[%s1173_s4 + $0x20] sm:$0xff] }
   0xe   :  { %727 = vmatmul.msk.f32.gmra.mxu0 %vm90_vm1, %v35_v12  ;;  %736 = vmatmul.msk.f32.gmra.mxu1 %vm90_vm1, %v35_v12 }
   0xf   :  { %745 = vmatmul.msk.f32.gmra.mxu2 %vm90_vm1, %v35_v12  ;;  %754 = vmatmul.msk.f32.gmra.mxu3 %vm90_vm1, %v35_v12 }
  0x10   :  { %72 = vperm.xlu1 %803, %v46_v13   ;;  %82 = vperm.xlu0 %802, %v48_v14  }
  0x12   :  { %62 = vperm.xlu2 %804, %v44_v22  }
  0x16   :  { %728 = vmatmul.msk.f32.gmra.mxu0 %vm90_vm1, %v36_v15  ;;  %737 = vmatmul.msk.f32.gmra.mxu1 %vm90_vm1, %v36_v15 }
  0x17   :  { %746 = vmatmul.msk.f32.gmra.mxu2 %vm90_vm1, %v36_v15  ;;  %755 = vmatmul.msk.f32.gmra.mxu3 %vm90_vm1, %v36_v15 }
  0x18   :  { %52 = vperm.xlu1 %803, %v42_v16   ;;  %57 = vperm.xlu0 %802, %v43_v17  }
  0x1a   :  { %377 = vperm.xlu2 %804, %v339_v26  }
  0x1e   :  { %729 = vmatmul.msk.f32.gmra.mxu0 %vm90_vm1, %v37_v19  ;;  %738 = vmatmul.msk.f32.gmra.mxu1 %vm90_vm1, %v37_v19 }
  0x1f   :  { %747 = vmatmul.msk.f32.gmra.mxu2 %vm90_vm1, %v37_v19  ;;  %756 = vmatmul.msk.f32.gmra.mxu3 %vm90_vm1, %v37_v19 }
  0x20   :  { %372 = vperm.xlu0 %802, %v338_v20   ;;  %367 = vperm.xlu1 %803, %v337_v21  }
  0x22   :  { %362 = vperm.xlu2 %804, %v336_v30  }
  0x26   :  { %730 = vmatmul.msk.f32.gmra.mxu0 %vm90_vm1, %v38_v23  ;;  %739 = vmatmul.msk.f32.gmra.mxu1 %vm90_vm1, %v38_v23 }
  0x27   :  { %748 = vmatmul.msk.f32.gmra.mxu2 %vm90_vm1, %v38_v23  ;;  %757 = vmatmul.msk.f32.gmra.mxu3 %vm90_vm1, %v38_v23 }
  0x28   :  { %357 = vperm.xlu0 %802, %v335_v24   ;;  %352 = vperm.xlu1 %803, %v334_v25  }
  0x2a   :  { %347 = vperm.xlu2 %804, %v333_v32  }
  0x2e   :  { %731 = vmatmul.msk.f32.gmra.mxu0 %vm90_vm1, %v39_v27  ;;  %740 = vmatmul.msk.f32.gmra.mxu1 %vm90_vm1, %v39_v27 }
  0x2f   :  { %749 = vmatmul.msk.f32.gmra.mxu2 %vm90_vm1, %v39_v27  ;;  %758 = vmatmul.msk.f32.gmra.mxu3 %vm90_vm1, %v39_v27 }
  0x30   :  { %342 = vperm.xlu0 %802, %v332_v28   ;;  %607 = vperm.xlu1 %803, %v603_v29  }
  0x32   :  { %612 = vperm.xlu2 %804, %v604_v34  }
  0x36   :  { %732 = vmatmul.msk.f32.gmra.mxu0 %vm90_vm1, %v40_v31  ;;  %741 = vmatmul.msk.f32.gmra.mxu1 %vm90_vm1, %v40_v31 }
  0x37   :  { %750 = vmatmul.msk.f32.gmra.mxu2 %vm90_vm1, %v40_v31  ;;  %759 = vmatmul.msk.f32.gmra.mxu3 %vm90_vm1, %v40_v31 }
  0x3e   :  { %733 = vmatmul.msk.f32.gmra.mxu0 %vm90_vm1, %v41_v33  ;;  %742 = vmatmul.msk.f32.gmra.mxu1 %vm90_vm1, %v41_v33 }
  0x3f   :  { %751 = vmatmul.msk.f32.gmra.mxu2 %vm90_vm1, %v41_v33  ;;  %760 = vmatmul.msk.f32.gmra.mxu3 %vm90_vm1, %v41_v33 }
  0x64   :  { %v1006_v63 = vpop.permute.xlu2 %67 }
  0x6c   :  { %v63_v21 = vpop.permute.xlu2 %62 }
  0x7a   :  { %v88_v57 = vpop.permute.xlu0 %87  ;;  %v78_v58 = vpop.permute.xlu1 %77 }
  0x82   :  { %v83_v0 = vpop.permute.xlu0 %82  ;;  %v73_v7 = vpop.permute.xlu1 %72 }
  0x83   :  { %v980_v35 = vpop.f32.mrf.mxu0  ;;  %v982_v36 = vpop.f32.mrf.mxu1 }
  0x8a   :  { %v984_v37 = vpop.f32.mrf.mxu2  ;;  %v986_v38 = vpop.f32.mrf.mxu3 }
  0x8b   :  { %v988_v39 = vpop.f32.mrf.mxu0  ;;  %v990_v40 = vpop.f32.mrf.mxu1 }
  0x8c   :  { %v58_v31 = vpop.permute.xlu0 %57 }
  0x92   :  { %v992_v41 = vpop.f32.mrf.mxu2  ;;  %v994_v42 = vpop.f32.mrf.mxu3 }
  0x93   :  { %v151_v43 = vpop.f32.mrf.mxu0  ;;  %v192_v44 = vpop.f32.mrf.mxu1 }
  0x94   :  { %v152_v30 = vadd.f32 %v151_v43, %v63_v21  ;;  %v190_v43 = vadd.f32 %v990_v40, %v58_v31 }
  0x9a   :  { %v996_v45 = vpop.f32.mrf.mxu2  ;;  %v998_v46 = vpop.f32.mrf.mxu3 }
  0x9b   :  { %v154_v47 = vpop.f32.mrf.mxu0  ;;  %v195_v48 = vpop.f32.mrf.mxu1 }
  0x9c   :  { %v155_v18 = vadd.f32 %v154_v47, %v1006_v63  ;;  %v196_v22 = vadd.f32 %v195_v48, %v1006_v63  ;;  %v193_v47 = vadd.f32 %v192_v44, %v63_v21  ;;  %v149_v48 = vadd.f32 %v988_v39, %v58_v31 }
  0x9d   :  { %v300_v44 = vmax.f32 %v152_v30, 0.0 }
  0xa2   :  { %v1000_v49 = vpop.f32.mrf.mxu2  ;;  %v1002_v50 = vpop.f32.mrf.mxu3 }
  0xa3   :  { %v157_v51 = vpop.f32.mrf.mxu0  ;;  %v198_v52 = vpop.f32.mrf.mxu1  ;;  %v278_v40 = vadd.f32 %v1002_v50, %v1006_v63 }
  0xa4   :  { %v158_v14 = vadd.f32 %v157_v51, %v73_v7  ;;  %v199_v16 = vadd.f32 %v198_v52, %v73_v7  ;;  %v304_v51 = vmax.f32 %v155_v18, 0.0  ;;  %v331_v18 = vld [vmem:[%s1175_s3 + $0x38] sm:$0xff] }
  0xa6   :  { %v308_v27 = vmax.f32 %v158_v14, 0.0  ;;  %v309_v32 = vmax.f32 %v199_v16, 0.0  ;;  %v327_v14 = vld [vmem:[%s1175_s3 + $0x18] sm:$0xff]  ;;  %v329_v16 = vld [vmem:[%s1175_s3 + $0x28] sm:$0xff] }
  0xaa   :  { %v239_v53 = vpop.f32.mrf.mxu2  ;;  %v1004_v54 = vpop.f32.mrf.mxu3 }
  0xab   :  { %v160_v55 = vpop.f32.mrf.mxu0  ;;  %v201_v56 = vpop.f32.mrf.mxu1 }
  0xac   :  { %v161_v10 = vadd.f32 %v160_v55, %v78_v58  ;;  %v202_v12 = vadd.f32 %v201_v56, %v78_v58  ;;  %v53_v56 = vpop.permute.xlu1 %52 }
  0xae   :  { %v312_v19 = vmax.f32 %v161_v10, 0.0  ;;  %v313_v23 = vmax.f32 %v202_v12, 0.0 }
  0xb2   :  { %v242_v59 = vpop.f32.mrf.mxu2  ;;  %v283_v60 = vpop.f32.mrf.mxu3 }
  0xb3   :  { %v163_v61 = vpop.f32.mrf.mxu0  ;;  %v204_v62 = vpop.f32.mrf.mxu1  ;;  %v243_v33 = vadd.f32 %v242_v59, %v78_v58  ;;  %v284_v52 = vadd.f32 %v283_v60, %v78_v58  ;;  %v146_v58 = vadd.f32 %v980_v35, %v53_v56  ;;  %v237_v60 = vadd.f32 %v1000_v49, %v1006_v63 }
  0xb4   :  { %v164_v4 = vadd.f32 %v163_v61, %v83_v0  ;;  %v205_v8 = vadd.f32 %v204_v62, %v83_v0  ;;  %v305_v61 = vmax.f32 %v196_v22, 0.0  ;;  %v240_v62 = vadd.f32 %v239_v53, %v73_v7 }
  0xb5   :  { %v314_v39 = vmax.f32 %v243_v33, 0.0  ;;  %v301_v53 = vmax.f32 %v193_v47, 0.0  ;;  %v297_v35 = vmax.f32 %v190_v43, 0.0  ;;  %v275_v49 = vadd.f32 %v998_v46, %v63_v21 }
  0xb6   :  { %v316_v15 = vmax.f32 %v164_v4, 0.0  ;;  %v317_v17 = vmax.f32 %v205_v8, 0.0  ;;  %v310_v4 = vmax.f32 %v240_v62, 0.0  ;;  %v272_v63 = vadd.f32 %v994_v42, %v58_v31  ;;  %v373_v62 = vpop.permute.xlu0 %372 }
  0xb7   :  { %v307_v8 = vmax.f32 %v278_v40, 0.0  ;;  %v228_v46 = vadd.f32 %v984_v37, %v53_v56  ;;  %v303_v10 = vmax.f32 %v275_v49, 0.0  ;;  %v325_v37 = vld [vmem:[%s1175_s3 + $0x8] sm:$0xff] }
  0xb8   :  { %v299_v12 = vmax.f32 %v272_v63, 0.0 }
  0xb9   :  { %v294_v42 = vmax.f32 %v228_v46, 0.0 }
  0xba   :  { %v245_v1 = vpop.f32.mrf.mxu2  ;;  %v286_v2 = vpop.f32.mrf.mxu3 }
  0xbb   :  { %v166_v3 = vpop.f32.mrf.mxu0  ;;  %v207_v6 = vpop.f32.mrf.mxu1  ;;  %v246_v24 = vadd.f32 %v245_v1, %v83_v0  ;;  %v287_v28 = vadd.f32 %v286_v2, %v83_v0  ;;  %v187_v0 = vadd.f32 %v982_v36, %v53_v56  ;;  %v315_v2 = vmax.f32 %v284_v52, 0.0 }
  0xbc   :  { %v167_v5 = vadd.f32 %v166_v3, %v88_v57  ;;  %v208_v9 = vadd.f32 %v207_v6, %v88_v57  ;;  %v234_v3 = vadd.f32 %v996_v45, %v63_v21  ;;  %v292_v6 = vmax.f32 %v146_v58, 0.0  ;;  %v324_v45 = vld [vmem:[%s1175_s3] sm:$0xff] }
  0xbd   :  { %v318_v1 = vmax.f32 %v246_v24, 0.0  ;;  %v319_v59 = vmax.f32 %v287_v28, 0.0  ;;  %v231_v36 = vadd.f32 %v992_v41, %v58_v31  ;;  %v293_v50 = vmax.f32 %v187_v0, 0.0 }
  0xbe   :  { %v320_v11 = vmax.f32 %v167_v5, 0.0  ;;  %v321_v13 = vmax.f32 %v208_v9, 0.0  ;;  %v302_v9 = vmax.f32 %v234_v3, 0.0  ;;  %v269_v41 = vadd.f32 %v986_v38, %v53_v56  ;;  %v326_v38 = vld [vmem:[%s1175_s3 + $0x10] sm:$0xff]  ;;  %v1109_v40 = vpop.permute.xlu0 %357 }
  0xc0   :  { %413 = vmatpush.msrb.mxu0 %v320_v11  ;;  %454 = vmatpush.msrb.mxu1 %v321_v13  ;;  %v298_v11 = vmax.f32 %v231_v36, 0.0  ;;  %v295_v13 = vmax.f32 %v269_v41, 0.0 }
  0xc2   :  { %v248_v20 = vpop.f32.mrf.mxu2  ;;  %414 = vmatpush.msrb.mxu0 %v316_v15  ;;  %v289_v26 = vpop.f32.mrf.mxu3  ;;  %455 = vmatpush.msrb.mxu1 %v317_v17  ;;  %v328_v15 = vld [vmem:[%s1175_s3 + $0x20] sm:$0xff]  ;;  %v330_v17 = vld [vmem:[%s1175_s3 + $0x30] sm:$0xff] }
  0xc3   :  { %v249_v25 = vadd.f32 %v248_v20, %v88_v57  ;;  %v290_v29 = vadd.f32 %v289_v26, %v88_v57  ;;  %v281_v57 = vadd.f32 %v1004_v54, %v73_v7  ;;  %v296_v54 = vmax.f32 %v149_v48, 0.0 }
  0xc4   :  { %415 = vmatpush.msrb.mxu0 %v312_v19  ;;  %456 = vmatpush.msrb.mxu1 %v313_v23  ;;  %v306_v7 = vmax.f32 %v237_v60, 0.0 }
  0xc5   :  { %v322_v34 = vmax.f32 %v249_v25, 0.0  ;;  %v323_v55 = vmax.f32 %v290_v29, 0.0  ;;  %v311_v5 = vmax.f32 %v281_v57, 0.0 }
  0xc6   :  { %416 = vmatpush.msrb.mxu0 %v308_v27  ;;  %457 = vmatpush.msrb.mxu1 %v309_v32 }
  0xc7   :  { %495 = vmatpush.msrb.mxu2 %v322_v34  ;;  %536 = vmatpush.msrb.mxu3 %v323_v55 }
  0xc8   :  { %417 = vmatpush.msrb.mxu0 %v304_v51  ;;  %458 = vmatpush.msrb.mxu1 %v305_v61  ;;  %v378_v61 = vpop.permute.xlu2 %377 }
  0xc9   :  { %496 = vmatpush.msrb.mxu2 %v318_v1  ;;  %537 = vmatpush.msrb.mxu3 %v319_v59 }
  0xca   :  { %418 = vmatpush.msrb.mxu0 %v300_v44  ;;  %459 = vmatpush.msrb.mxu1 %v301_v53  ;;  %v368_v44 = vpop.permute.xlu1 %367 }
  0xcb   :  { %497 = vmatpush.msrb.mxu2 %v314_v39  ;;  %538 = vmatpush.msrb.mxu3 %v315_v2 }
  0xcc   :  { %419 = vmatpush.msrb.mxu0 %v296_v54  ;;  %460 = vmatpush.msrb.mxu1 %v297_v35 }
  0xcd   :  { %498 = vmatpush.msrb.mxu2 %v310_v4  ;;  %539 = vmatpush.msrb.mxu3 %v311_v5 }
  0xce   :  { %420 = vmatpush.msrb.mxu0 %v292_v6  ;;  %461 = vmatpush.msrb.mxu1 %v293_v50 }
  0xcf   :  { %499 = vmatpush.msrb.mxu2 %v306_v7  ;;  %540 = vmatpush.msrb.mxu3 %v307_v8 }
  0xd0   :  { %761 = vmatmul.msk.f32.vlgmr.msrb.gmra.mxu0 %vm380_vm2, %v324_v45  ;;  %769 = vmatmul.msk.f32.vlgmr.msrb.gmra.mxu1 %vm380_vm2, %v324_v45  ;;  %v1107_v58 = vpop.permute.xlu2 %362 }
  0xd1   :  { %500 = vmatpush.msrb.mxu2 %v302_v9  ;;  %541 = vmatpush.msrb.mxu3 %v303_v10 }
  0xd2   :  { %v353_v46 = vpop.permute.xlu1 %352 }
  0xd3   :  { %501 = vmatpush.msrb.mxu2 %v298_v11  ;;  %542 = vmatpush.msrb.mxu3 %v299_v12 }
  0xd5   :  { %502 = vmatpush.msrb.mxu2 %v294_v42  ;;  %543 = vmatpush.msrb.mxu3 %v295_v13 }
  0xd6   :  { %777 = vmatmul.msk.f32.vlgmr.msrb.gmra.mxu2 %vm380_vm2, %v324_v45  ;;  %785 = vmatmul.msk.f32.vlgmr.msrb.gmra.mxu3 %vm380_vm2, %v324_v45 }
  0xd8   :  { %762 = vmatmul.msk.f32.gmra.mxu0 %vm380_vm2, %v325_v37  ;;  %770 = vmatmul.msk.f32.gmra.mxu1 %vm380_vm2, %v325_v37  ;;  %v348_v12 = vpop.permute.xlu2 %347 }
  0xde   :  { %778 = vmatmul.msk.f32.gmra.mxu2 %vm380_vm2, %v325_v37  ;;  %786 = vmatmul.msk.f32.gmra.mxu3 %vm380_vm2, %v325_v37 }
  0xe0   :  { %763 = vmatmul.msk.f32.gmra.mxu0 %vm380_vm2, %v326_v38  ;;  %771 = vmatmul.msk.f32.gmra.mxu1 %vm380_vm2, %v326_v38 }
  0xe6   :  { %779 = vmatmul.msk.f32.gmra.mxu2 %vm380_vm2, %v326_v38  ;;  %787 = vmatmul.msk.f32.gmra.mxu3 %vm380_vm2, %v326_v38 }
  0xe8   :  { %764 = vmatmul.msk.f32.gmra.mxu0 %vm380_vm2, %v327_v14  ;;  %772 = vmatmul.msk.f32.gmra.mxu1 %vm380_vm2, %v327_v14 }
  0xee   :  { %780 = vmatmul.msk.f32.gmra.mxu2 %vm380_vm2, %v327_v14  ;;  %788 = vmatmul.msk.f32.gmra.mxu3 %vm380_vm2, %v327_v14  ;;  %v343_v14 = vpop.permute.xlu0 %342 }
  0xf0   :  { %765 = vmatmul.msk.f32.gmra.mxu0 %vm380_vm2, %v328_v15  ;;  %773 = vmatmul.msk.f32.gmra.mxu1 %vm380_vm2, %v328_v15 }
  0xf6   :  { %781 = vmatmul.msk.f32.gmra.mxu2 %vm380_vm2, %v328_v15  ;;  %789 = vmatmul.msk.f32.gmra.mxu3 %vm380_vm2, %v328_v15 }
  0xf8   :  { %766 = vmatmul.msk.f32.gmra.mxu0 %vm380_vm2, %v329_v16  ;;  %774 = vmatmul.msk.f32.gmra.mxu1 %vm380_vm2, %v329_v16 }
  0xfe   :  { %782 = vmatmul.msk.f32.gmra.mxu2 %vm380_vm2, %v329_v16  ;;  %790 = vmatmul.msk.f32.gmra.mxu3 %vm380_vm2, %v329_v16 }
 0x100   :  { %767 = vmatmul.msk.f32.gmra.mxu0 %vm380_vm2, %v330_v17  ;;  %775 = vmatmul.msk.f32.gmra.mxu1 %vm380_vm2, %v330_v17 }
 0x106   :  { %783 = vmatmul.msk.f32.gmra.mxu2 %vm380_vm2, %v330_v17  ;;  %791 = vmatmul.msk.f32.gmra.mxu3 %vm380_vm2, %v330_v17 }
 0x108   :  { %768 = vmatmul.msk.f32.gmra.mxu0 %vm380_vm2, %v331_v18  ;;  %776 = vmatmul.msk.f32.gmra.mxu1 %vm380_vm2, %v331_v18 }
 0x10e   :  { %784 = vmatmul.msk.f32.gmra.mxu2 %vm380_vm2, %v331_v18  ;;  %792 = vmatmul.msk.f32.gmra.mxu3 %vm380_vm2, %v331_v18 }
 0x14d   :  { %v1081_v19 = vpop.f32.mrf.mxu0  ;;  %v1083_v20 = vpop.f32.mrf.mxu1 }
 0x14e   :  { %v423_v18 = vadd.f32 %v1081_v19, %v343_v14 }
 0x150   :  { %v569_v19 = vmax.f32 %v423_v18, 0.0 }
 0x155   :  { %v425_v21 = vpop.f32.mrf.mxu0  ;;  %v1085_v22 = vpop.f32.mrf.mxu1 }
 0x156   :  { %v426_v37 = vadd.f32 %v425_v21, %v348_v12  ;;  %v467_v15 = vadd.f32 %v1085_v22, %v348_v12 }
 0x158   :  { %v574_v22 = vmax.f32 %v467_v15, 0.0 }
 0x159   :  { %v1087_v23 = vpop.f32.mrf.mxu2  ;;  %v1089_v24 = vpop.f32.mrf.mxu3 }
 0x15d   :  { %v428_v25 = vpop.f32.mrf.mxu0  ;;  %v469_v26 = vpop.f32.mrf.mxu1 }
 0x15e   :  { %v429_v10 = vadd.f32 %v428_v25, %v353_v46  ;;  %v470_v42 = vadd.f32 %v469_v26, %v353_v46  ;;  %v464_v26 = vadd.f32 %v1083_v20, %v343_v14 }
 0x161   :  { %v1091_v27 = vpop.f32.mrf.mxu2  ;;  %v1093_v28 = vpop.f32.mrf.mxu3 }
 0x165   :  { %v431_v29 = vpop.f32.mrf.mxu0  ;;  %v472_v30 = vpop.f32.mrf.mxu1 }
 0x166   :  { %v432_v63 = vadd.f32 %v431_v29, %v1109_v40  ;;  %v473_v9 = vadd.f32 %v472_v30, %v1109_v40  ;;  %v577_v29 = vmax.f32 %v429_v10, 0.0 }
 0x168   :  { %v581_v38 = vmax.f32 %v432_v63, 0.0  ;;  %v582_v16 = vmax.f32 %v473_v9, 0.0  ;;  %v613_v63 = vpop.permute.xlu2 %612 }
 0x169   :  { %v1095_v31 = vpop.f32.mrf.mxu2  ;;  %v1097_v32 = vpop.f32.mrf.mxu3 }
 0x16d   :  { %v434_v33 = vpop.f32.mrf.mxu0  ;;  %v475_v34 = vpop.f32.mrf.mxu1 }
 0x16e   :  { %v435_v6 = vadd.f32 %v434_v33, %v1107_v58  ;;  %v476_v50 = vadd.f32 %v475_v34, %v1107_v58  ;;  %v578_v34 = vmax.f32 %v470_v42, 0.0 }
 0x170   :  { %v585_v11 = vmax.f32 %v435_v6, 0.0  ;;  %v586_v13 = vmax.f32 %v476_v50, 0.0 }
 0x171   :  { %v1099_v47 = vpop.f32.mrf.mxu2  ;;  %v1101_v51 = vpop.f32.mrf.mxu3 }
 0x175   :  { %v437_v52 = vpop.f32.mrf.mxu0  ;;  %v478_v55 = vpop.f32.mrf.mxu1 }
 0x176   :  { %v438_v3 = vadd.f32 %v437_v52, %v368_v44  ;;  %v479_v35 = vadd.f32 %v478_v55, %v368_v44  ;;  %v573_v55 = vmax.f32 %v426_v37, 0.0 }
 0x178   :  { %v589_v8 = vmax.f32 %v438_v3, 0.0  ;;  %v590_v41 = vmax.f32 %v479_v35, 0.0  ;;  %v505_v35 = vadd.f32 %v1087_v23, %v343_v14 }
 0x179   :  { %v1103_v48 = vpop.f32.mrf.mxu2  ;;  %v1105_v56 = vpop.f32.mrf.mxu3 }
 0x17a   :  { %v517_v20 = vadd.f32 %v1103_v48, %v1107_v58 }
 0x17d   :  { %v440_v1 = vpop.f32.mrf.mxu0  ;;  %v481_v43 = vpop.f32.mrf.mxu1 }
 0x17e   :  { %v441_v39 = vadd.f32 %v440_v1, %v373_v62  ;;  %v482_v2 = vadd.f32 %v481_v43, %v373_v62 }
 0x180   :  { %v593_v36 = vmax.f32 %v441_v39, 0.0  ;;  %v594_v45 = vmax.f32 %v482_v2, 0.0 }
 0x181   :  { %v519_v57 = vpop.f32.mrf.mxu2  ;;  %v560_v59 = vpop.f32.mrf.mxu3 }
 0x182   :  { %v520_v43 = vadd.f32 %v519_v57, %v368_v44  ;;  %v601_v57 = vld [vmem:[%s1176_s5] sm:$0xff] }
 0x184   :  { %v591_v2 = vmax.f32 %v520_v43, 0.0 }
 0x185   :  { %v443_v60 = vpop.f32.mrf.mxu0  ;;  %v484_v0 = vpop.f32.mrf.mxu1 }
 0x186   :  { %v444_v53 = vadd.f32 %v443_v60, %v378_v61  ;;  %v485_v54 = vadd.f32 %v484_v0, %v378_v61  ;;  %v561_v60 = vadd.f32 %v560_v59, %v368_v44  ;;  %v570_v0 = vmax.f32 %v464_v26, 0.0 }
 0x187   :  { %v514_v59 = vadd.f32 %v1099_v47, %v1109_v40  ;;  %v555_v44 = vadd.f32 %v1101_v51, %v1109_v40  ;;  %v508_v47 = vadd.f32 %v1091_v27, %v348_v12  ;;  %v549_v51 = vadd.f32 %v1093_v28, %v348_v12 }
 0x188   :  { %v597_v4 = vmax.f32 %v444_v53, 0.0  ;;  %v598_v49 = vmax.f32 %v485_v54, 0.0  ;;  %v592_v48 = vmax.f32 %v561_v60, 0.0  ;;  %v587_v54 = vmax.f32 %v517_v20, 0.0 }
 0x189   :  { %v522_v5 = vpop.f32.mrf.mxu2  ;;  %v563_v7 = vpop.f32.mrf.mxu3  ;;  %v583_v40 = vmax.f32 %v514_v59, 0.0  ;;  %v575_v6 = vmax.f32 %v508_v47, 0.0  ;;  %v576_v27 = vmax.f32 %v549_v51, 0.0  ;;  %v571_v28 = vmax.f32 %v505_v35, 0.0 }
 0x18a   :  { %629 = vmatpush.msra.mxu0 %v597_v4  ;;  %652 = vmatpush.msra.mxu1 %v598_v49  ;;  %v523_v30 = vadd.f32 %v522_v5, %v373_v62  ;;  %v564_v52 = vadd.f32 %v563_v7, %v373_v62  ;;  %v584_v4 = vmax.f32 %v555_v44, 0.0  ;;  %v546_v49 = vadd.f32 %v1089_v24, %v343_v14  ;;  %v608_v24 = vpop.permute.xlu1 %607 }
 0x18c   :  { %630 = vmatpush.msra.mxu0 %v593_v36  ;;  %653 = vmatpush.msra.mxu1 %v594_v45  ;;  %v595_v53 = vmax.f32 %v523_v30, 0.0  ;;  %v596_v62 = vmax.f32 %v564_v52, 0.0  ;;  %v572_v23 = vmax.f32 %v546_v49, 0.0 }
 0x18e   :  { %631 = vmatpush.msra.mxu0 %v589_v8  ;;  %654 = vmatpush.msra.mxu1 %v590_v41 }
 0x190   :  { %632 = vmatpush.msra.mxu0 %v585_v11  ;;  %655 = vmatpush.msra.mxu1 %v586_v13 }
 0x191   :  { %v525_v17 = vpop.f32.mrf.mxu2  ;;  %v566_v33 = vpop.f32.mrf.mxu3 }
 0x192   :  { %v526_v25 = vadd.f32 %v525_v17, %v378_v61  ;;  %633 = vmatpush.msra.mxu0 %v581_v38  ;;  %v567_v21 = vadd.f32 %v566_v33, %v378_v61  ;;  %656 = vmatpush.msra.mxu1 %v582_v16  ;;  %v558_v61 = vadd.f32 %v1105_v56, %v1107_v58 }
 0x193   :  { %v511_v56 = vadd.f32 %v1095_v31, %v353_v46  ;;  %v552_v58 = vadd.f32 %v1097_v32, %v353_v46  ;;  %v602_v32 = vld [vmem:[%s1176_s5 + $0x8] sm:$0x1] }
 0x194   :  { %v599_v1 = vmax.f32 %v526_v25, 0.0  ;;  %634 = vmatpush.msra.mxu0 %v577_v29  ;;  %v600_v39 = vmax.f32 %v567_v21, 0.0  ;;  %657 = vmatpush.msra.mxu1 %v578_v34  ;;  %v588_v3 = vmax.f32 %v558_v61, 0.0 }
 0x195   :  { %v579_v5 = vmax.f32 %v511_v56, 0.0  ;;  %v580_v31 = vmax.f32 %v552_v58, 0.0 }
 0x196   :  { %635 = vmatpush.msra.mxu0 %v573_v55  ;;  %675 = vmatpush.msra.mxu2 %v599_v1 }
 0x197   :  { %658 = vmatpush.msra.mxu1 %v574_v22  ;;  %698 = vmatpush.msra.mxu3 %v600_v39 }
 0x198   :  { %636 = vmatpush.msra.mxu0 %v569_v19  ;;  %676 = vmatpush.msra.mxu2 %v595_v53 }
 0x199   :  { %659 = vmatpush.msra.mxu1 %v570_v0  ;;  %699 = vmatpush.msra.mxu3 %v596_v62 }
 0x19a   :  { %793 = vmatmul.msk.f32.vlgmr.msra.gmra.mxu0 %vm380_vm2, %v601_v57  ;;  %795 = vmatmul.msk.f32.vlgmr.msra.gmra.mxu1 %vm380_vm2, %v601_v57 }
 0x19b   :  { %677 = vmatpush.msra.mxu2 %v591_v2  ;;  %700 = vmatpush.msra.mxu3 %v592_v48 }
 0x19d   :  { %678 = vmatpush.msra.mxu2 %v587_v54  ;;  %701 = vmatpush.msra.mxu3 %v588_v3 }
 0x19f   :  { %679 = vmatpush.msra.mxu2 %v583_v40  ;;  %702 = vmatpush.msra.mxu3 %v584_v4 }
 0x1a1   :  { %680 = vmatpush.msra.mxu2 %v579_v5  ;;  %703 = vmatpush.msra.mxu3 %v580_v31 }
 0x1a2   :  { %794 = vmatmul.msk.f32.gmra.mxu0 %vm380_vm2, %v602_v32  ;;  %796 = vmatmul.msk.f32.gmra.mxu1 %vm380_vm2, %v602_v32 }
 0x1a3   :  { %681 = vmatpush.msra.mxu2 %v575_v6  ;;  %704 = vmatpush.msra.mxu3 %v576_v27 }
 0x1a5   :  { %682 = vmatpush.msra.mxu2 %v571_v28  ;;  %705 = vmatpush.msra.mxu3 %v572_v23 }
 0x1a6   :  { %797 = vmatmul.msk.f32.vlgmr.msra.gmra.mxu2 %vm380_vm2, %v601_v57  ;;  %799 = vmatmul.msk.f32.vlgmr.msra.gmra.mxu3 %vm380_vm2, %v601_v57 }
 0x1ae   :  { %798 = vmatmul.msk.f32.gmra.mxu2 %vm380_vm2, %v602_v32  ;;  %800 = vmatmul.msk.f32.gmra.mxu3 %vm380_vm2, %v602_v32 }
 0x217   :  { %v638_v36 = vpop.f32.mrf.mxu0  ;;  %v661_v7 = vpop.f32.mrf.mxu1 }
 0x218   :  { %v639_v50 = vadd.f32 %v638_v36, %v608_v24  ;;  %v662_v45 = vadd.f32 %v661_v7, %v608_v24 }
 0x21a   :  { %713 = vst [vmem:[%s1177_s7] sm:$0xff] %v639_v50 }
 0x21b   :  { %714 = vst [vmem:[%s1177_s7 + $0x8] sm:$0xff] %v662_v45 }
 0x21f   :  { %v641_v8 = vpop.f32.mrf.mxu0  ;;  %v664_v46 = vpop.f32.mrf.mxu1 }
 0x220   :  { %v642_v9 = vadd.f32 %v641_v8, %v613_v63  ;;  %v665_v41 = vadd.f32 %v664_v46, %v613_v63 }
 0x222   :  { %717 = vst [vmem:[%s1177_s7 + $0x20] sm:$0x1] %v642_v9 }
 0x223   :  { %718 = vst [vmem:[%s1177_s7 + $0x28] sm:$0x1] %v665_v41 }
 0x229   :  { %v684_v10 = vpop.f32.mrf.mxu2  ;;  %v707_v11 = vpop.f32.mrf.mxu3 }
 0x22a   :  { %v685_v12 = vadd.f32 %v684_v10, %v608_v24  ;;  %v708_v42 = vadd.f32 %v707_v11, %v608_v24 }
 0x22c   :  { %715 = vst [vmem:[%s1177_s7 + $0x10] sm:$0xff] %v685_v12 }
 0x22d   :  { %716 = vst [vmem:[%s1177_s7 + $0x18] sm:$0xff] %v708_v42 }
 0x231   :  { %v687_v13 = vpop.f32.mrf.mxu2  ;;  %v710_v37 = vpop.f32.mrf.mxu3 }
 0x232   :  { %v688_v38 = vadd.f32 %v687_v13, %v613_v63  ;;  %v711_v14 = vadd.f32 %v710_v37, %v613_v63 }
 0x234   :  { %719 = vst [vmem:[%s1177_s7 + $0x30] sm:$0x1] %v688_v38 }
 0x235   :  { %720 = vst [vmem:[%s1177_s7 + $0x38] sm:$0x1] %v711_v14 }

</bundles_post_ra>
